<compile_context>
chip_gen: v7x
topology: tpu7x:2x2x1
jax: 0.10.0
libtpu: 0.0.40
codegen_flags: <defaults>
</compile_context>

<pallas_src>
import functools

import jax
import jax.numpy as jnp
from jax.experimental import pallas as pl
from jax.experimental.pallas import tpu as pltpu  # noqa: F401  (TPU-kernel convention)


def _round_up(n, m):
    return ((n + m - 1) // m) * m


# ----------------------------------------------------------------------------
# Kernel 1: GaussianPrior.forward  ->  fused (loc, scale) parameter block.
# ----------------------------------------------------------------------------
def _prior_params_kernel(fused_ref, params_ref):
    # fused_ref / params_ref: (2, Zp), Zp a multiple of 128.
    # Row 0 = loc, row 1 = scale.  One whole-block, full-lane store.
    params_ref[...] = fused_ref[...]


@jax.jit
def gaussian_prior_forward(mean, std):
    """Return (loc, scale) of Independent(Normal(loc, scale), 1)."""
    z_dim = mean.shape[0]
    z_pad = _round_up(max(z_dim, 1), 128)
    pad = z_pad - z_dim

    # Fused lane-dense (2, z_pad) parameter block.  scale row padded with 1.0
    # so padded lanes never produce a divide-by-zero downstream.
    fused = jnp.concatenate(
        [
            jnp.pad(mean.astype(jnp.float32)[None, :], ((0, 0), (0, pad))),
            jnp.pad(std.astype(jnp.float32)[None, :], ((0, 0), (0, pad)),
                    constant_values=1.0),
        ],
        axis=0,
    )

    params = pl.pallas_call(
        _prior_params_kernel,
        grid=(),
        out_shape=jax.ShapeDtypeStruct((2, z_pad), jnp.float32),
        in_specs=[pl.BlockSpec((2, z_pad), lambda: (0, 0))],
        out_specs=pl.BlockSpec((2, z_pad), lambda: (0, 0)),
        input_output_aliases={0: 0},
        cost_estimate=pl.CostEstimate(
            flops=0, transcendentals=0, bytes_accessed=2 * 4 * 2 * z_pad),
    )(fused)

    loc = params[0, :z_dim]
    scale = params[1, :z_dim]
    return loc, scale


# ----------------------------------------------------------------------------
# Kernel 2 (downstream consumer, per review): fused reparameterized sample
# + Independent(Normal).log_prob over a (batch, z_dim) block.
# ----------------------------------------------------------------------------
def _sample_logprob_kernel(params_ref, eps_ref, z_ref, lp_ref, *, z_dim):
    loc = params_ref[0:1, :]      # (1, Zp)
    scale = params_ref[1:2, :]    # (1, Zp)
    eps = eps_ref[...]            # (B, Zp)

    # Reparameterized sample.
    z = loc + scale * eps
    z_ref[...] = z

    # log N(z; loc, scale) with (z - loc)/scale == eps exactly.
    log_terms = (-0.5 * eps * eps) - jnp.log(scale) - 0.5 * jnp.log(2.0 * jnp.pi)

    # Mask out padded lanes, then reduce over the event dim (Independent(.., 1)).
    lane = jax.lax.broadcasted_iota(jnp.int32, eps.shape, 1)
    valid = lane < z_dim
    lp_ref[...] = jnp.sum(jnp.where(valid, log_terms, 0.0), axis=-1, keepdims=True)


@jax.jit
def prior_sample_and_log_prob(mean, std, eps):
    """z = loc + scale * eps ; log_prob = Independent(Normal).log_prob(z)."""
    z_dim = mean.shape[0]
    batch = eps.shape[0]
    z_pad = _round_up(max(z_dim, 1), 128)
    pad = z_pad - z_dim

    params = jnp.concatenate(
        [
            jnp.pad(mean.astype(jnp.float32)[None, :], ((0, 0), (0, pad))),
            jnp.pad(std.astype(jnp.float32)[None, :], ((0, 0), (0, pad)),
                    constant_values=1.0),
        ],
        axis=0,
    )
    eps_p = jnp.pad(eps.astype(jnp.float32), ((0, 0), (0, pad)))

    z_p, lp = pl.pallas_call(
        functools.partial(_sample_logprob_kernel, z_dim=z_dim),
        grid=(),
        out_shape=(
            jax.ShapeDtypeStruct((batch, z_pad), jnp.float32),
            jax.ShapeDtypeStruct((batch, 1), jnp.float32),
        ),
        in_specs=[
            pl.BlockSpec((2, z_pad), lambda: (0, 0)),
            pl.BlockSpec((batch, z_pad), lambda: (0, 0)),
        ],
        out_specs=(
            pl.BlockSpec((batch, z_pad), lambda: (0, 0)),
            pl.BlockSpec((batch, 1), lambda: (0, 0)),
        ),
    )(params, eps_p)

    return z_p[:, :z_dim], lp[:, 0]


if __name__ == "__main__":
    z_dim = 64   # small latent dimension, consistent with the module
    batch = 8

    # Module parameters exactly as in GaussianPrior.__init__ (non-trainable).
    mean_param = jnp.zeros((z_dim,), dtype=jnp.float32)
    std_param = jnp.ones((z_dim,), dtype=jnp.float32)

    # forward(): the distribution, represented by its (loc, scale) tensors.
    loc, scale = gaussian_prior_forward(mean_param, std_param)
    jax.block_until_ready((loc, scale))
    assert loc.shape == (z_dim,) and scale.shape == (z_dim,)
    assert bool(jnp.all(loc == 0.0))
    assert bool(jnp.all(scale == 1.0))

    # Downstream fused kernel: reparameterized sample + log_prob.
    key = jax.random.PRNGKey(0)
    eps = jax.random.normal(key, (batch, z_dim), dtype=jnp.float32)
    z, log_prob = prior_sample_and_log_prob(mean_param, std_param, eps)
    jax.block_until_ready((z, log_prob))
    assert z.shape == (batch, z_dim) and log_prob.shape == (batch,)

    # Reference check against plain-JAX Independent(Normal(loc, scale), 1).
    z_ref = loc[None, :] + scale[None, :] * eps
    lp_ref = jnp.sum(
        jax.scipy.stats.norm.logpdf(z_ref, loc[None, :], scale[None, :]), axis=-1)
    assert jnp.allclose(z, z_ref, atol=1e-6)
    assert jnp.allclose(log_prob, lp_ref, atol=1e-4, rtol=1e-4)

    # TODO(synk): torch.distributions.Independent(Normal(...), 1) as a Python
    # distribution object has no Pallas equivalent; it is represented by its
    # (loc, scale) parameters plus the fused sample/log_prob kernel above.
    print("KERNEL_OK")
</pallas_src>

<mosaic_0001>
module attributes {stable_mosaic.version = 11 : i64} {
  func.func @_prior_params_kernel(%arg0: memref<2x128xf32, #tpu.memory_space<vmem>>, %arg1: memref<2x128xf32, #tpu.memory_space<vmem>>) attributes {dimension_semantics = [], scalar_prefetch = 0 : i64, scratch_operands = 0 : i64, tpu.core_type = #tpu.core_type<tc>} {
    %c0 = arith.constant 0 : index
    %c0_0 = arith.constant 0 : index
    %0 = vector.load %arg0[%c0, %c0_0] : memref<2x128xf32, #tpu.memory_space<vmem>>, vector<2x128xf32>
    %c0_1 = arith.constant 0 : index
    %c0_2 = arith.constant 0 : index
    %1 = vector.load %arg1[%c0_1, %c0_2] : memref<2x128xf32, #tpu.memory_space<vmem>>, vector<2x128xf32>
    tpu.vector_store %arg1[%c0_1, %c0_2], %0 {strides = array<i32>} : memref<2x128xf32, #tpu.memory_space<vmem>>, vector<2x128xf32>,
    return
  }
}

</mosaic_0001>

<bundles_post_ra>
// kernel: gaussian_prior_forward.1
= control target key start
LH: loop header
LB: loop body
LE: loop exit
PB: predicated region body
PF: predicated region fallthrough
CT: control target
= control target key end

     0   :  { %s30_s0 = inlined_call_operand.vmem [shape: f32[2,128], index: 0, kind: input, shape index: {}, may-alias: {0,1}]   ;;  %s31_s1 = inlined_call_operand.vmem [shape: f32[2,128], index: 1, kind: output, shape index: {}, may-alias: {0,1}]  }
   0x1   :  { %v8_v0 = vld [vmem:[%s30_s0] sm:$0x3] }
   0x2   :  { %9 = vst [vmem:[%s31_s1] sm:$0x3] %v8_v0 }

</bundles_post_ra>
